<compile_context>
chip_gen: v7x
topology: tpu7x:2x2x1
jax: 0.10.0
libtpu: 0.0.40
codegen_flags: <defaults>
</compile_context>

<pallas_src>
import jax
import jax.numpy as jnp
from jax import lax
from jax.experimental import pallas as pl
from jax.experimental.pallas import tpu as pltpu


# ------------------------- Pallas kernel ------------------------------------

def _gate_kernel(ws_ref, wt_ref, b_ref, s_ref, t_ref, o_ref):
    """Fused gate: g = sigmoid(Ws_bd @ S + Wt_bd @ T + b); out = (1-g)*T + g*S.

    Shapes inside the kernel:
      ws_ref / wt_ref : (BC, BC)   block-diagonal linear weights (BC = bs*c)
      b_ref           : (BC, 1)
      s_ref / t_ref   : (BC, TP)   channel-major slabs, spatial on the lane axis
      o_ref           : (BC, TP)
    """
    s = s_ref[...]
    t = t_ref[...]
    z = jnp.dot(ws_ref[...], s, preferred_element_type=jnp.float32)
    z = z + jnp.dot(wt_ref[...], t, preferred_element_type=jnp.float32)
    g = jax.nn.sigmoid(z + b_ref[...])
    o_ref[...] = (1.0 - g) * t + g * s


# ------------------------- forward wrapper ----------------------------------

def gate_control_forward(s, t, w, b):
    """Gate_control.forward(s, t) with Linear weight w (c, 2c) and bias b (c,)."""
    bs, c, d, h, w_sp = s.shape
    P = d * h * w_sp
    BC = bs * c

    # Free (contiguous) views: (bs, c, d, h, w) -> (bs*c, P). No transpose needed.
    s2 = s.reshape(BC, P)
    t2 = t.reshape(BC, P)

    # nn.Linear(2c, c): y = x @ w.T + b, with x = [s_feats | t_feats].
    # Split into the s-part and t-part and expand each to a block-diagonal
    # (bs*c, bs*c) matrix so the whole batch is handled by one matmul pair.
    eye = jnp.eye(bs, dtype=w.dtype)
    ws_bd = jnp.kron(eye, w[:, :c])            # (BC, BC)
    wt_bd = jnp.kron(eye, w[:, c:])            # (BC, BC)
    b_bd = jnp.tile(b, bs).reshape(BC, 1)      # (BC, 1)

    # Lane-tile the spatial axis only if it is large; at test sizes this is one step.
    TP = P if P <= 8192 else 8192
    assert P % TP == 0, "spatial extent must be a multiple of the lane tile"
    grid = (P // TP,)

    out = pl.pallas_call(
        _gate_kernel,
        out_shape=jax.ShapeDtypeStruct((BC, P), jnp.float32),
        grid=grid,
        in_specs=[
            pl.BlockSpec((BC, BC), lambda p: (0, 0)),
            pl.BlockSpec((BC, BC), lambda p: (0, 0)),
            pl.BlockSpec((BC, 1), lambda p: (0, 0)),
            pl.BlockSpec((BC, TP), lambda p: (0, p)),
            pl.BlockSpec((BC, TP), lambda p: (0, p)),
        ],
        out_specs=pl.BlockSpec((BC, TP), lambda p: (0, p)),
        compiler_params=pltpu.CompilerParams(
            dimension_semantics=("parallel",)),
    )(ws_bd, wt_bd, b_bd, s2, t2)

    # Module ends with `out.reshape(bs, c, d, h, w)` applied to a (bs, P, c) tensor,
    # i.e. a raw memory reinterpretation. Our kernel output is channel-major
    # (bs, c, P); one XLA transpose reproduces the exact same element ordering.
    return out.reshape(bs, c, P).transpose(0, 2, 1).reshape(bs, c, d, h, w_sp)


# ------------------------- pure-JAX reference (for verification) ------------

def gate_control_reference(s, t, w, b):
    bs, c, d, h, w_sp = s.shape
    P = d * h * w_sp
    s2 = s.reshape(bs, c, P).transpose(0, 2, 1)          # (bs, P, c)
    t2 = t.reshape(bs, c, P).transpose(0, 2, 1)          # (bs, P, c)
    st = jnp.concatenate([s2, t2], axis=2)               # (bs, P, 2c)
    weight = jax.nn.sigmoid(
        jnp.dot(st, w.T, precision=lax.Precision.HIGHEST) + b)
    out = (1.0 - weight) * t2 + weight * s2               # (bs, P, c)
    return out.reshape(bs, c, d, h, w_sp)                 # raw reshape, as in PyTorch


# ------------------------- main ---------------------------------------------

if __name__ == "__main__":
    bs, c, d, h, w_sp = 2, 4, 4, 16, 16     # (batch, channel, depth, height, width)

    key = jax.random.PRNGKey(0)
    ks, kt, kw, kb = jax.random.split(key, 4)
    s = jax.random.normal(ks, (bs, c, d, h, w_sp), jnp.float32)
    t = jax.random.normal(kt, (bs, c, d, h, w_sp), jnp.float32)

    # nn.Linear(2c, c) default init: U(-1/sqrt(2c), 1/sqrt(2c)).
    lim = 1.0 / (2 * c) ** 0.5
    w = jax.random.uniform(kw, (c, 2 * c), jnp.float32, minval=-lim, maxval=lim)
    b = jax.random.uniform(kb, (c,), jnp.float32, minval=-lim, maxval=lim)

    out = jax.block_until_ready(gate_control_forward(s, t, w, b))
    ref = jax.block_until_ready(gate_control_reference(s, t, w, b))

    assert out.shape == (bs, c, d, h, w_sp), out.shape
    assert bool(jnp.allclose(out, ref, atol=1e-4, rtol=1e-4)), "mismatch vs reference"
    print("KERNEL_OK")
</pallas_src>

<mosaic_0001>
module attributes {stable_mosaic.version = 11 : i64} {
  func.func @_gate_kernel(%arg0: i32, %arg1: memref<8x8xf32, #tpu.memory_space<vmem>>, %arg2: memref<8x8xf32, #tpu.memory_space<vmem>>, %arg3: memref<8x1xf32, #tpu.memory_space<vmem>>, %arg4: memref<8x1024xf32, #tpu.memory_space<vmem>>, %arg5: memref<8x1024xf32, #tpu.memory_space<vmem>>, %arg6: memref<8x1024xf32, #tpu.memory_space<vmem>>) attributes {dimension_semantics = [#tpu.dimension_semantics<parallel>], iteration_bounds = array<i64: 1>, scalar_prefetch = 0 : i64, scratch_operands = 0 : i64, tpu.core_type = #tpu.core_type<tc>, window_params = [{pipeline_mode = #tpu.pipeline_mode<synchronous>, transform_indices = @transform_0, window_bounds = array<i64: 8, 8>}, {pipeline_mode = #tpu.pipeline_mode<synchronous>, transform_indices = @transform_1, window_bounds = array<i64: 8, 8>}, {pipeline_mode = #tpu.pipeline_mode<synchronous>, transform_indices = @transform_2, window_bounds = array<i64: 8, 1>}, {transform_indices = @transform_3, window_bounds = array<i64: 8, 1024>}, {transform_indices = @transform_4, window_bounds = array<i64: 8, 1024>}, {transform_indices = @transform_5, window_bounds = array<i64: 8, 1024>}]} {
    %c0 = arith.constant 0 : index
    %c0_0 = arith.constant 0 : index
    %0 = vector.load %arg4[%c0, %c0_0] : memref<8x1024xf32, #tpu.memory_space<vmem>>, vector<8x1024xf32>
    %c0_1 = arith.constant 0 : index
    %c0_2 = arith.constant 0 : index
    %1 = vector.load %arg5[%c0_1, %c0_2] : memref<8x1024xf32, #tpu.memory_space<vmem>>, vector<8x1024xf32>
    %c0_3 = arith.constant 0 : index
    %c0_4 = arith.constant 0 : index
    %2 = vector.load %arg1[%c0_3, %c0_4] : memref<8x8xf32, #tpu.memory_space<vmem>>, vector<8x8xf32>
    %cst = arith.constant dense<0.000000e+00> : vector<8x1024xf32>
    %3 = tpu.matmul %2, %0, %cst {dimension_numbers = #tpu.dot_dimension_numbers<[1], [0], [0], [1], [0, 0, 1, 1], [], []>} : vector<8x8xf32>, vector<8x1024xf32>, vector<8x1024xf32> -> vector<8x1024xf32>
    %c0_5 = arith.constant 0 : index
    %c0_6 = arith.constant 0 : index
    %4 = vector.load %arg2[%c0_5, %c0_6] : memref<8x8xf32, #tpu.memory_space<vmem>>, vector<8x8xf32>
    %cst_7 = arith.constant dense<0.000000e+00> : vector<8x1024xf32>
    %5 = tpu.matmul %4, %1, %cst_7 {dimension_numbers = #tpu.dot_dimension_numbers<[1], [0], [0], [1], [0, 0, 1, 1], [], []>} : vector<8x8xf32>, vector<8x1024xf32>, vector<8x1024xf32> -> vector<8x1024xf32>
    %6 = arith.addf %3, %5 : vector<8x1024xf32>
    %c0_8 = arith.constant 0 : index
    %c0_9 = arith.constant 0 : index
    %7 = vector.load %arg3[%c0_8, %c0_9] : memref<8x1xf32, #tpu.memory_space<vmem>>, vector<8x1xf32>
    %8 = vector.broadcast %7 : vector<8x1xf32> to vector<8x1024xf32>
    %9 = arith.addf %6, %8 : vector<8x1024xf32>
    %10 = arith.negf %9 : vector<8x1024xf32>
    %11 = math.exp %10 : vector<8x1024xf32>
    %cst_10 = arith.constant 1.000000e+00 : f32
    %12 = vector.broadcast %cst_10 : f32 to vector<8x1024xf32>
    %13 = arith.addf %12, %11 : vector<8x1024xf32>
    %14 = arith.divf %12, %13 : vector<8x1024xf32>
    %cst_11 = arith.constant 1.000000e+00 : f32
    %15 = vector.broadcast %cst_11 : f32 to vector<8x1024xf32>
    %16 = arith.subf %15, %14 : vector<8x1024xf32>
    %17 = arith.mulf %16, %1 : vector<8x1024xf32>
    %18 = arith.mulf %14, %0 : vector<8x1024xf32>
    %19 = arith.addf %17, %18 : vector<8x1024xf32>
    %c0_12 = arith.constant 0 : index
    %c0_13 = arith.constant 0 : index
    %20 = vector.load %arg6[%c0_12, %c0_13] : memref<8x1024xf32, #tpu.memory_space<vmem>>, vector<8x1024xf32>
    tpu.vector_store %arg6[%c0_12, %c0_13], %19 {strides = array<i32>} : memref<8x1024xf32, #tpu.memory_space<vmem>>, vector<8x1024xf32>,
    return
  }
  func.func @transform_0(%arg0: i32) -> (i32, i32) {
    %c0_i32 = arith.constant 0 : i32
    %c0_i32_0 = arith.constant 0 : i32
    %c0_i32_1 = arith.constant 0 : i32
    return %c0_i32, %c0_i32_0 : i32, i32
  }
  func.func @transform_1(%arg0: i32) -> (i32, i32) {
    %c0_i32 = arith.constant 0 : i32
    %c0_i32_0 = arith.constant 0 : i32
    %c0_i32_1 = arith.constant 0 : i32
    return %c0_i32, %c0_i32_0 : i32, i32
  }
  func.func @transform_2(%arg0: i32) -> (i32, i32) {
    %c0_i32 = arith.constant 0 : i32
    %c0_i32_0 = arith.constant 0 : i32
    %c0_i32_1 = arith.constant 0 : i32
    return %c0_i32, %c0_i32_0 : i32, i32
  }
  func.func @transform_3(%arg0: i32) -> (i32, i32) {
    %c0_i32 = arith.constant 0 : i32
    %c0_i32_0 = arith.constant 0 : i32
    return %c0_i32, %arg0 : i32, i32
  }
  func.func @transform_4(%arg0: i32) -> (i32, i32) {
    %c0_i32 = arith.constant 0 : i32
    %c0_i32_0 = arith.constant 0 : i32
    return %c0_i32, %arg0 : i32, i32
  }
  func.func @transform_5(%arg0: i32) -> (i32, i32) {
    %c0_i32 = arith.constant 0 : i32
    %c0_i32_0 = arith.constant 0 : i32
    return %c0_i32, %arg0 : i32, i32
  }
}

</mosaic_0001>

<bundles_post_ra>
// kernel: tpu_custom_call.1
= control target key start
LH: loop header
LB: loop body
LE: loop exit
PB: predicated region body
PF: predicated region fallthrough
CT: control target
= control target key end

     0   :  { %10 = vsyncpa [#allocation3], 0  ;;  %s1086_s0 = inlined_call_operand.vmem [shape: f32[8,8], index: 0, kind: input, shape index: {}]   ;;  %s1087_s1 = inlined_call_operand.hbm [shape: f32[8,8], index: 1, kind: input, shape index: {}]   ;;  %s1088_s2 = inlined_call_operand.vmem [shape: f32[8,1], index: 2, kind: input, shape index: {}]   ;;  %s1089_s3 = inlined_call_operand.hbm [shape: f32[8,1024], index: 3, kind: input, shape index: {}]   ;;  %s1090_s4 = inlined_call_operand.hbm [shape: f32[8,1024], index: 4, kind: input, shape index: {}]   ;;  %s1091_s5 = inlined_call_operand.hbm [shape: f32[8,1024], index: 5, kind: output, shape index: {}]  }
   0x1   :  { %11 = vsyncpa [#allocation6], 0 }
   0x2   :  { %12 = vsyncpa [#allocation4], 0  ;;  %s924_s18 = smov [#allocation5]   ;;  %s925_s20 = smov [#allocation2]  }
   0x3   :  { %s33_s19 = sshll.u32 %s924_s18, 4  ;;  %s21_s21 = sshll.u32 %s925_s20, 4  ;;  %s34_s19 = int_to_ptr.vmem [resolvable:$true] %s33_s19  ;;  %s22_s21 = int_to_ptr.vmem [resolvable:$true] %s21_s21 }
   0x4   :  { %s830_s24 = scalar_lea.hbm %s1089_s3, 1024 }
   0x5   :  { %p831_p0 = scmp.ne.s32.totalorder %s1089_s3, %s830_s24  ;;  %p834_p1 = scmp.lt.u32.totalorder %s830_s24, %s1089_s3 }
   0x7   :  { %p836_p2 = pnand %p834_p1, %p831_p0 }
   0x9   :  { %839 = shalt.err (!%p836_p2)
}
   0xa   :  { %s840_s29 = scalar_lea.vmem %s34_s19, 1024  ;;  %p845_p4 = scmp.lt.s32.totalorder %s34_s19, %s34_s19 }
   0xb   :  { %p841_p3 = scmp.ne.s32.totalorder %s34_s19, %s840_s29  ;;  %p846_p5 = scmp.lt.s32.totalorder %s840_s29, %s840_s29 }
   0xd   :  { %p847_p6 = por %p846_p5, %p845_p4 }
   0xf   :  { %p848_p7 = pnand %p847_p6, %p841_p3 }
  0x11   :  { %851 = shalt.err (!%p848_p7)
}
  0x12   :  { %36 = dma.hbm_to_vmem [thread:$0]  %s1089_s3, 1024, %s34_s19, [#allocation6]  }
  0x13   :  { %s852_s9 = scalar_lea.hbm %s1087_s1, 128 }
  0x14   :  { %p853_p8 = scmp.ne.s32.totalorder %s1087_s1, %s852_s9  ;;  %p856_p9 = scmp.lt.u32.totalorder %s852_s9, %s1087_s1 }
  0x16   :  { %p858_p10 = pnand %p856_p9, %p853_p8 }
  0x18   :  { %861 = shalt.err (!%p858_p10)
}
  0x19   :  { %s862_s14 = scalar_lea.vmem %s22_s21, 128  ;;  %p867_p12 = scmp.lt.s32.totalorder %s22_s21, %s22_s21 }
  0x1a   :  { %p863_p11 = scmp.ne.s32.totalorder %s22_s21, %s862_s14  ;;  %p868_p13 = scmp.lt.s32.totalorder %s862_s14, %s862_s14 }
  0x1c   :  { %p869_p0 = por %p868_p13, %p867_p12 }
  0x1e   :  { %p870_p1 = pnand %p869_p0, %p863_p11 }
  0x20   :  { %873 = shalt.err (!%p870_p1)
}
  0x21   :  { %24 = dma.hbm_to_vmem [thread:$0]  %s1087_s1, 128, %s22_s21, [#allocation3]  }
  0x22   :  { %s926_s16 = smov [#allocation7]   ;;  %s874_s20 = scalar_lea.hbm %s1090_s4, 1024 }
  0x23   :  { %s43_s17 = sshll.u32 %s926_s16, 4  ;;  %p875_p2 = scmp.ne.s32.totalorder %s1090_s4, %s874_s20  ;;  %s44_s17 = int_to_ptr.vmem [resolvable:$true] %s43_s17 }
  0x24   :  { %p878_p3 = scmp.lt.u32.totalorder %s874_s20, %s1090_s4 }
  0x26   :  { %p880_p4 = pnand %p878_p3, %p875_p2 }
  0x28   :  { %883 = shalt.err (!%p880_p4)
}
  0x29   :  { %s884_s26 = scalar_lea.vmem %s44_s17, 1024  ;;  %p889_p6 = scmp.lt.s32.totalorder %s44_s17, %s44_s17 }
  0x2a   :  { %p885_p5 = scmp.ne.s32.totalorder %s44_s17, %s884_s26  ;;  %p890_p7 = scmp.lt.s32.totalorder %s884_s26, %s884_s26 }
  0x2c   :  { %p891_p8 = por %p890_p7, %p889_p6 }
  0x2e   :  { %p892_p9 = pnand %p891_p8, %p885_p5 }
  0x30   :  { %895 = shalt.err (!%p892_p9)
}
  0x31   :  { %46 = dma.hbm_to_vmem [thread:$0]  %s1090_s4, 1024, %s44_s17, [#allocation6]  }
  0x32   :  { %918 = dma.done.wait [#allocation3], 128  }
  0x33   :  { %919 = vsyncadd [#allocation3], 4294967168 }
  0x34   :  { %920 = dma.done.wait [#allocation6], 2048  }
  0x35   :  { %921 = vsyncadd [#allocation6], 4294965248  ;;  %v927_v0 = vmov 0.0   ;;  %v928_v1 = vmov 0   ;;  %v996_v2 = vld [vmem:[#allocation7 + $0x8] sm:$0xff]  ;;  %v998_v3 = vld [vmem:[#allocation7 + $0x18] sm:$0xff] }
  0x36   :  { %142 = vmatprep.mubr.f32.mxu0 %v927_v0  ;;  %213 = vmatprep.mubr.f32.mxu1 %v927_v0  ;;  %v1000_v4 = vld [vmem:[#allocation7] sm:$0xff]  ;;  %vm74_vm0 = vcmask 64512   ;;  %v1004_v5 = vld [vmem:[#allocation7 + $0x10] sm:$0xff]  ;;  %v73_v6 = vld [vmem:[#allocation2] sm:$0xff] }
  0x37   :  { %797 = vset.pattern.permute.xlu0 %v928_v1  ;;  %78 = vmatprep.subr.mxu0 %v996_v2  ;;  %v1006_v7 = vld [vmem:[#allocation7 + $0x28] sm:$0xff]  ;;  %v1010_v8 = vld [vmem:[#allocation7 + $0x38] sm:$0xff]  ;;  %v1012_v9 = vld [vmem:[#allocation7 + $0x20] sm:$0xff] }
  0x38   :  { %149 = vmatprep.subr.mxu1 %v998_v3  ;;  %79 = vmatpush1.msra.mxu0 %v1000_v4  ;;  %v1014_v10 = vld [vmem:[#allocation7 + $0x30] sm:$0xff]  ;;  %v1022_v11 = vld [vmem:[#allocation5 + $0x8] sm:$0xff]  ;;  %v1024_v12 = vld [vmem:[#allocation5 + $0x18] sm:$0xff] }
  0x39   :  { %150 = vmatpush1.msra.mxu1 %v1004_v5  ;;  %767 = vmatmul.mubr.msk.f32.vlgmr.msra.gmra.mrb[0].mxu0 %vm74_vm0, %v73_v6  ;;  %v1026_v13 = vld [vmem:[#allocation5] sm:$0xff]  ;;  %v1028_v14 = vld [vmem:[#allocation5 + $0x10] sm:$0xff]  ;;  %v72_v15 = vld [vmem:[%s1086_s0] sm:$0xff] }
  0x3a   :  { %768 = vmatmul.mubr.msk.f32.vlgmr.msra.gmra.mrb[0].mxu1 %vm74_vm0, %v73_v6  ;;  %220 = vmatprep.subr.mxu0 %v1006_v7  ;;  %v1039_v16 = vld [vmem:[#allocation5 + $0x28] sm:$0xff]  ;;  %v1041_v17 = vld [vmem:[#allocation5 + $0x38] sm:$0xff]  ;;  %v1043_v18 = vld [vmem:[#allocation5 + $0x20] sm:$0xff] }
  0x3b   :  { %291 = vmatprep.subr.mxu1 %v1010_v8  ;;  %221 = vmatpush1.msra.mxu0 %v1012_v9  ;;  %v1045_v19 = vld [vmem:[#allocation5 + $0x30] sm:$0xff]  ;;  %v649_v20 = vld [vmem:[%s1088_s2] sm:$0xff]  ;;  %s929_s2 = smov [#allocation8]  }
  0x3c   :  { %292 = vmatpush1.msra.mxu1 %v1014_v10  ;;  %284 = vmatprep.mubr.f32.mxu0 %v927_v0  ;;  %s757_s29 = sshll.u32 %s929_s2, 4  ;;  %s758_s29 = int_to_ptr.vmem [resolvable:$true] %s757_s29 }
  0x3d   :  { %355 = vmatprep.mubr.f32.mxu1 %v927_v0  ;;  %769 = vmatmul.mubr.msk.f32.vlgmr.msra.gmra.mrb[2].mxu0 %vm74_vm0, %v73_v6  ;;  %s896_s30 = scalar_lea.vmem %s758_s29, 1024  ;;  %p901_p11 = scmp.lt.s32.totalorder %s758_s29, %s758_s29 }
  0x3e   :  { %770 = vmatmul.mubr.msk.f32.vlgmr.msra.gmra.mrb[2].mxu1 %vm74_vm0, %v73_v6  ;;  %365 = vmatprep.subr.mxu0 %v1022_v11  ;;  %p897_p10 = scmp.ne.s32.totalorder %s758_s29, %s896_s30  ;;  %p902_p12 = scmp.lt.s32.totalorder %s896_s30, %s896_s30 }
  0x3f   :  { %436 = vmatprep.subr.mxu1 %v1024_v12  ;;  %366 = vmatpush1.msra.mxu0 %v1026_v13 }
  0x40   :  { %437 = vmatpush1.msra.mxu1 %v1028_v14  ;;  %429 = vmatprep.mubr.f32.mxu0 %v927_v0  ;;  %p903_p13 = por %p902_p12, %p901_p11 }
  0x41   :  { %500 = vmatprep.mubr.f32.mxu1 %v927_v0  ;;  %771 = vmatmul.mubr.msk.f32.vlgmr.msra.gmra.mrb[0].mxu0 %vm74_vm0, %v72_v15 }
  0x42   :  { %772 = vmatmul.mubr.msk.f32.vlgmr.msra.gmra.mrb[0].mxu1 %vm74_vm0, %v72_v15  ;;  %507 = vmatprep.subr.mxu0 %v1039_v16  ;;  %p904_p0 = pnand %p903_p13, %p897_p10 }
  0x43   :  { %578 = vmatprep.subr.mxu1 %v1041_v17  ;;  %508 = vmatpush1.msra.mxu0 %v1043_v18 }
  0x44   :  { %579 = vmatpush1.msra.mxu1 %v1045_v19  ;;  %571 = vmatprep.mubr.f32.mxu0 %v927_v0 }
  0x45   :  { %642 = vmatprep.mubr.f32.mxu1 %v927_v0  ;;  %773 = vmatmul.mubr.msk.f32.vlgmr.msra.gmra.mrb[2].mxu0 %vm74_vm0, %v72_v15 }
  0x46   :  { %774 = vmatmul.mubr.msk.f32.vlgmr.msra.gmra.mrb[2].mxu1 %vm74_vm0, %v72_v15  ;;  %652 = vperm.xlu0 %797, %v649_v20  }
  0xc5   :  { %v653_v21 = vpop.permute.xlu0 %652 }
 0x114   :  { %v431_v22 = vpop.f32.mrb[0].mxu0 }
 0x115   :  { %v502_v23 = vpop.f32.mrb[0].mxu1  ;;  %v655_v24 = vadd.f32 %v653_v21, %v431_v22  ;;  %v433_v26 = vpop.f32.mrb[1].mxu0 }
 0x116   :  { %v657_v25 = vadd.f32 %v653_v21, %v502_v23  ;;  %v504_v27 = vpop.f32.mrb[1].mxu1  ;;  %v656_v28 = vadd.f32 %v653_v21, %v433_v26 }
 0x117   :  { %v658_v29 = vadd.f32 %v653_v21, %v504_v27  ;;  %v775_v30 = vmul.f32 -1.442695, %v655_v24 }
 0x118   :  { %v777_v31 = vmul.f32 -1.442695, %v657_v25  ;;  %v776_v32 = vmul.f32 -1.442695, %v656_v28  ;;  %v573_v34 = vpop.f32.mrb[2].mxu0 }
 0x119   :  { %v778_v33 = vmul.f32 -1.442695, %v658_v29  ;;  %v644_v35 = vpop.f32.mrb[2].mxu1  ;;  %798 = vpow2.f32 %v775_v30  ;;  %v659_v36 = vadd.f32 %v653_v21, %v573_v34  ;;  %v575_v38 = vpop.f32.mrb[3].mxu0 }
 0x11a   :  { %v661_v37 = vadd.f32 %v653_v21, %v644_v35  ;;  %v646_v39 = vpop.f32.mrb[3].mxu1  ;;  %800 = vpow2.f32 %v777_v31  ;;  %v660_v40 = vadd.f32 %v653_v21, %v575_v38 }
 0x11b   :  { %v662_v41 = vadd.f32 %v653_v21, %v646_v39  ;;  %802 = vpow2.f32 %v776_v32  ;;  %v779_v42 = vmul.f32 -1.442695, %v659_v36 }
 0x11c   :  { %v781_v43 = vmul.f32 -1.442695, %v661_v37  ;;  %804 = vpow2.f32 %v778_v33  ;;  %v780_v44 = vmul.f32 -1.442695, %v660_v40 }
 0x11d   :  { %v782_v45 = vmul.f32 -1.442695, %v662_v41  ;;  %806 = vpow2.f32 %v779_v42 }
 0x11e   :  { %808 = vpow2.f32 %v781_v43 }
 0x11f   :  { %810 = vpow2.f32 %v780_v44 }
 0x120   :  { %812 = vpow2.f32 %v782_v45 }
 0x123   :  { %v799_v46 = vpop.eup %798 }
 0x124   :  { %v801_v47 = vpop.eup %800  ;;  %v687_v48 = vadd.f32 1.0, %v799_v46 }
 0x125   :  { %v803_v49 = vpop.eup %802  ;;  %v689_v50 = vadd.f32 1.0, %v801_v47 }
 0x126   :  { %v805_v51 = vpop.eup %804  ;;  %814 = vrcp.f32 %v687_v48  ;;  %v688_v52 = vadd.f32 1.0, %v803_v49 }
 0x127   :  { %v807_v53 = vpop.eup %806  ;;  %816 = vrcp.f32 %v689_v50  ;;  %v690_v54 = vadd.f32 1.0, %v805_v51 }
 0x128   :  { %v809_v55 = vpop.eup %808  ;;  %818 = vrcp.f32 %v688_v52  ;;  %v691_v56 = vadd.f32 1.0, %v807_v53 }
 0x129   :  { %v811_v57 = vpop.eup %810  ;;  %820 = vrcp.f32 %v690_v54  ;;  %v693_v58 = vadd.f32 1.0, %v809_v55 }
 0x12a   :  { %v813_v59 = vpop.eup %812  ;;  %822 = vrcp.f32 %v691_v56  ;;  %v692_v60 = vadd.f32 1.0, %v811_v57 }
 0x12b   :  { %824 = vrcp.f32 %v693_v58  ;;  %v694_v61 = vadd.f32 1.0, %v813_v59 }
 0x12c   :  { %826 = vrcp.f32 %v692_v60 }
 0x12d   :  { %828 = vrcp.f32 %v694_v61 }
 0x130   :  { %v815_v62 = vpop.eup %814 }
 0x131   :  { %v817_v63 = vpop.eup %816  ;;  %v711_v0 = vsub.f32 1.0, %v815_v62  ;;  %v727_v21 = vmul.f32 %v815_v62, %v1026_v13 }
 0x132   :  { %v819_v1 = vpop.eup %818  ;;  %v713_v6 = vsub.f32 1.0, %v817_v63  ;;  %v729_v25 = vmul.f32 %v817_v63, %v1028_v14 }
 0x133   :  { %v821_v15 = vpop.eup %820  ;;  %v719_v20 = vmul.f32 %v711_v0, %v1000_v4  ;;  %v712_v22 = vsub.f32 1.0, %v819_v1  ;;  %v728_v30 = vmul.f32 %v819_v1, %v1022_v11 }
 0x134   :  { %v823_v23 = vpop.eup %822  ;;  %v721_v24 = vmul.f32 %v713_v6, %v1004_v5  ;;  %v714_v26 = vsub.f32 1.0, %v821_v15  ;;  %v730_v13 = vmul.f32 %v821_v15, %v1024_v12 }
 0x135   :  { %v825_v27 = vpop.eup %824  ;;  %v735_v28 = vadd.f32 %v727_v21, %v719_v20  ;;  %v720_v29 = vmul.f32 %v712_v22, %v996_v2  ;;  %v715_v31 = vsub.f32 1.0, %v823_v23  ;;  %v731_v36 = vmul.f32 %v823_v23, %v1043_v18 }
 0x136   :  { %v827_v32 = vpop.eup %826  ;;  %v737_v33 = vadd.f32 %v729_v25, %v721_v24  ;;  %v722_v4 = vmul.f32 %v714_v26, %v998_v3  ;;  %v717_v34 = vsub.f32 1.0, %v825_v27  ;;  %v733_v38 = vmul.f32 %v825_v27, %v1045_v19 }
 0x137   :  { %v829_v35 = vpop.eup %828  ;;  %743 = vst [vmem:[#allocation8] sm:$0xff] %v735_v28  ;;  %v736_v5 = vadd.f32 %v728_v30, %v720_v29  ;;  %v723_v14 = vmul.f32 %v715_v31, %v1012_v9  ;;  %v716_v37 = vsub.f32 1.0, %v827_v32  ;;  %v732_v40 = vmul.f32 %v827_v32, %v1039_v16 }
 0x138   :  { %745 = vst [vmem:[#allocation8 + $0x10] sm:$0xff] %v737_v33  ;;  %v738_v2 = vadd.f32 %v730_v13, %v722_v4  ;;  %v725_v11 = vmul.f32 %v717_v34, %v1014_v10  ;;  %v718_v39 = vsub.f32 1.0, %v829_v35  ;;  %v734_v41 = vmul.f32 %v829_v35, %v1041_v17 }
 0x139   :  { %744 = vst [vmem:[#allocation8 + $0x8] sm:$0xff] %v736_v5  ;;  %v739_v3 = vadd.f32 %v731_v36, %v723_v14  ;;  %v724_v12 = vmul.f32 %v716_v37, %v1006_v7 }
 0x13a   :  { %746 = vst [vmem:[#allocation8 + $0x18] sm:$0xff] %v738_v2  ;;  %v741_v9 = vadd.f32 %v733_v38, %v725_v11  ;;  %v726_v18 = vmul.f32 %v718_v39, %v1010_v8 }
 0x13b   :  { %747 = vst [vmem:[#allocation8 + $0x20] sm:$0xff] %v739_v3  ;;  %v740_v42 = vadd.f32 %v732_v40, %v724_v12 }
 0x13c   :  { %749 = vst [vmem:[#allocation8 + $0x30] sm:$0xff] %v741_v9  ;;  %v742_v10 = vadd.f32 %v734_v41, %v726_v18 }
 0x13d   :  { %748 = vst [vmem:[#allocation8 + $0x28] sm:$0xff] %v740_v42 }
 0x13e   :  { %750 = vst [vmem:[#allocation8 + $0x38] sm:$0xff] %v742_v10 }
 0x13f   :  { %907 = shalt.err (!%p904_p0)
}
 0x140   :  { %s908_s8 = scalar_lea.hbm %s1091_s5, 1024 }
 0x141   :  { %p909_p1 = scmp.ne.s32.totalorder %s1091_s5, %s908_s8  ;;  %p912_p2 = scmp.lt.u32.totalorder %s908_s8, %s1091_s5 }
 0x143   :  { %p914_p3 = pnand %p912_p2, %p909_p1 }
 0x145   :  { %917 = shalt.err (!%p914_p3)
}
 0x146   :  { %760 = dma.vmem_to_hbm [thread:$0]  %s758_s29, 1024, %s1091_s5, [#allocation4]  }
 0x147   :  { %922 = dma.done.wait [#allocation4], 1024  }
 0x148   :  { %923 = vsyncadd [#allocation4], 4294966272 }
 0x149   :  { %764 = vsyncpa [#allocation3], 1 }
 0x14a   :  { %765 = vsyncpa [#allocation6], 1 }
 0x14b   :  { %766 = vsyncpa [#allocation4], 1 }

</bundles_post_ra>
